<compile_context>
chip_gen: v6e
topology: v6e:2x2x1
jax: 0.10.0
libtpu: 0.0.40
codegen_flags: <defaults>
</compile_context>

<pallas_src>
import jax
import jax.numpy as jnp
from jax import lax
from jax.experimental import pallas as pl
from jax.experimental.pallas import tpu as pltpu


_MAX_BATCH_FUSE = 8  # cap on the static in-kernel unroll over fused batch rows


def dwconv_kernel(idxs_ref, x_ref, w_ref, b_ref, o_ref):
    # idxs_ref : SMEM (2,) int32 scalar-prefetch (segment split points)
    # x_ref    : VMEM (tb, N, tc)
    # w_ref    : VMEM (3, tc)   depthwise taps per channel
    # b_ref    : VMEM (1, tc)   bias per channel
    # o_ref    : VMEM (tb, N, tc)
    i0 = idxs_ref[0]
    i1 = idxs_ref[1]
    tb, N, _ = x_ref.shape

    # Hoisted once per grid step: segment-boundary keep-masks as float 0/1
    # (single multiply per shifted tap instead of selects), tap rows, bias.
    pos = lax.broadcasted_iota(jnp.int32, (N, 1), 0)
    keep_prev = ((pos != 0) & (pos != i0) & (pos != i1)).astype(x_ref.dtype)
    keep_next = ((pos != N - 1) & (pos != i0 - 1) & (pos != i1 - 1)).astype(x_ref.dtype)

    w0 = w_ref[0:1, :]
    w1 = w_ref[1:2, :]
    w2 = w_ref[2:3, :]
    bias = b_ref[...]

    # tb is a small static constant (<= _MAX_BATCH_FUSE); unrolled on purpose.
    # pltpu.roll needs shift >= 0: rolling by N-1 along a length-N axis equals
    # rolling by -1; the wrapped rows are zeroed by the boundary masks.
    for bi in range(tb):
        x = x_ref[bi]                                         # (N, tc)
        x_prev = pltpu.roll(x, shift=1, axis=0) * keep_prev       # x[t-1]
        x_next = pltpu.roll(x, shift=N - 1, axis=0) * keep_next   # x[t+1]
        y = x_prev * w0 + x * w1 + x_next * w2 + bias
        o_ref[bi] = y.astype(o_ref.dtype)


def _vmem_capacity_bytes():
    """Per-TensorCore VMEM capacity; conservative fallback = v7x (64 MiB)."""
    try:
        info = pltpu.get_tpu_info()
        cap = getattr(info, "vmem_capacity_bytes", None)
        if cap:
            return int(cap)
    except Exception:
        pass
    return 64 * 1024 * 1024


def _select_tiling(B, N, C, itemsize):
    """Pick (tb, tc, vmem_limit). C is already padded to a multiple of 128."""
    cap = _vmem_capacity_bytes()
    # 2x double-buffered input + 2x output blocks must fit, with headroom:
    # ~12 MiB/block on v7x (64 MiB VMEM), ~24 MiB/block on v5e/v6e (128 MiB).
    per_block = (cap * 3) // 16
    target = min(per_block, 4 * 1024 * 1024)  # 1-4 MiB blocks saturate HBM

    # Channel tile: prefer the full (contiguous DMA) channel width, otherwise
    # the largest lane-aligned divisor for which one sequence fits the budget.
    if N * C * itemsize <= per_block:
        tc = C
    else:
        tc = 128
        for cand in (2048, 1024, 512, 256, 128):
            if C % cand == 0 and N * cand * itemsize <= per_block:
                tc = cand
                break
        # TODO(synk): halo-DMA N tiling for sequences where even (N,128)
        # exceeds per_block (see file-header TODO).

    # Batch fusion: amortize per-grid-step overhead when one sequence is small.
    tb = 1
    for cand in range(min(B, _MAX_BATCH_FUSE), 0, -1):
        if B % cand == 0 and cand * N * tc * itemsize <= target:
            tb = cand
            break

    # Keep >= 2 grid steps so both v7x TensorCores get work (free elsewhere).
    if (B // tb) * (C // tc) < 2:
        if tb > 1:
            for cand in range(tb - 1, 0, -1):
                if B % cand == 0:
                    tb = cand
                    break
        elif C % 256 == 0:
            tc = C // 2

    block_bytes = tb * N * tc * itemsize
    vmem_limit = int(min(cap, max(32 * 1024 * 1024, 6 * block_bytes)))
    return tb, tc, vmem_limit


def dwconv(x, w, b, idxs):
    """Segment-wise depthwise conv1d (k=3, pad=1, groups=C).

    x: (B, N, C); w: (3, C) with w[k, c] = Conv1d.weight[c, 0, k];
    b: (1, C) bias; idxs: length-2 ints (segment split points)."""
    B, N, C = x.shape
    itemsize = jnp.dtype(x.dtype).itemsize

    # Pad channels to a lane-dense multiple of 128 (unmasked vector stores).
    # Pure wrapper-side layout plumbing; the tail is sliced off below.
    C_pad = -(-C // 128) * 128
    if C_pad != C:
        pc = C_pad - C
        x = jnp.pad(x, ((0, 0), (0, 0), (0, pc)))
        w = jnp.pad(w, ((0, 0), (0, pc)))
        b = jnp.pad(b, ((0, 0), (0, pc)))

    tb, tc, vmem_limit = _select_tiling(B, N, C_pad, itemsize)
    grid = (B // tb, C_pad // tc)

    bytes_accessed = (2 * B * N * C_pad + w.size + b.size) * itemsize
    cost = pl.CostEstimate(flops=6 * B * N * C_pad, transcendentals=0,
                           bytes_accessed=int(bytes_accessed))

    out = pl.pallas_call(
        dwconv_kernel,
        out_shape=jax.ShapeDtypeStruct((B, N, C_pad), x.dtype),
        grid_spec=pltpu.PrefetchScalarGridSpec(
            num_scalar_prefetch=1,
            grid=grid,
            in_specs=[
                pl.BlockSpec((tb, N, tc), lambda bi, ci, sidx: (bi, 0, ci)),
                pl.BlockSpec((3, tc), lambda bi, ci, sidx: (0, ci)),
                pl.BlockSpec((1, tc), lambda bi, ci, sidx: (0, ci)),
            ],
            out_specs=pl.BlockSpec((tb, N, tc), lambda bi, ci, sidx: (bi, 0, ci)),
        ),
        compiler_params=pltpu.CompilerParams(
            dimension_semantics=("parallel", "parallel"),
            vmem_limit_bytes=vmem_limit),
        cost_estimate=cost,
    )(jnp.asarray(idxs, jnp.int32), x, w, b)

    if C_pad != C:
        out = out[..., :C]
    return out


def dwconv_reference(x, w, b, idxs):
    """Pure-JAX reference: segment-wise depthwise conv1d (k=3, pad=1)."""
    def seg(xs):  # (B, L, C)
        xp = jnp.pad(xs, ((0, 0), (1, 1), (0, 0)))
        return xp[:, :-2] * w[0] + xp[:, 1:-1] * w[1] + xp[:, 2:] * w[2] + b
    i0, i1 = idxs
    return jnp.concatenate(
        [seg(x[:, :i0]), seg(x[:, i0:i1]), seg(x[:, i1:])], axis=1)


def _run_case(key, B, N, C, idxs):
    kx, kw, kb = jax.random.split(key, 3)
    x = jax.random.normal(kx, (B, N, C), dtype=jnp.float32)
    # Conv1d(dim, dim, 3, groups=dim) weight is (C, 1, 3); stored here as (3, C).
    w = jax.random.normal(kw, (3, C), dtype=jnp.float32) * 0.1
    b = jax.random.normal(kb, (1, C), dtype=jnp.float32) * 0.1
    out = jax.block_until_ready(dwconv(x, w, b, idxs))
    ref = dwconv_reference(x, w, b, idxs)
    assert out.shape == (B, N, C)
    assert jnp.allclose(out, ref, atol=1e-5, rtol=1e-5), (B, N, C, idxs)


if __name__ == "__main__":
    key = jax.random.PRNGKey(0)
    k1, k2, k3 = jax.random.split(key, 3)

    # Case 1: module default dim=64 -> exercises the C-padding (64 -> 128) path.
    _run_case(k1, B=2, N=16, C=64, idxs=(5, 11))

    # Case 2: lane-aligned channels, full-width contiguous (tc == C) blocks.
    _run_case(k2, B=2, N=16, C=256, idxs=(7, 12))

    # Case 3: batch-fused blocks (tb > 1), padded channels (96 -> 128), and a
    # degenerate empty first segment (idxs[0] == 0).
    _run_case(k3, B=8, N=24, C=96, idxs=(0, 13))

    print("KERNEL_OK")
</pallas_src>

<mosaic_0001>
module attributes {stable_mosaic.version = 11 : i64} {
  func.func @dwconv_kernel(%arg0: i32, %arg1: i32, %arg2: memref<2xi32, #tpu.memory_space<smem>>, %arg3: memref<1x16x128xf32, #tpu.memory_space<vmem>>, %arg4: memref<3x128xf32, #tpu.memory_space<vmem>>, %arg5: memref<1x128xf32, #tpu.memory_space<vmem>>, %arg6: memref<1x16x128xf32, #tpu.memory_space<vmem>>) attributes {dimension_semantics = [#tpu.dimension_semantics<parallel>, #tpu.dimension_semantics<parallel>], iteration_bounds = array<i64: 2, 1>, scalar_prefetch = 1 : i64, scratch_operands = 0 : i64, tpu.core_type = #tpu.core_type<tc>, window_params = [{transform_indices = @transform_0, window_bounds = array<i64: 1, 16, 128>}, {transform_indices = @transform_1, window_bounds = array<i64: 3, 128>}, {transform_indices = @transform_2, window_bounds = array<i64: 1, 128>}, {transform_indices = @transform_3, window_bounds = array<i64: 1, 16, 128>}]} {
    %c0 = arith.constant 0 : index
    %0 = memref.load %arg2[%c0] : memref<2xi32, #tpu.memory_space<smem>>
    %c1 = arith.constant 1 : index
    %1 = memref.load %arg2[%c1] : memref<2xi32, #tpu.memory_space<smem>>
    %2 = tpu.iota {dimensions = array<i32: 0>} : vector<16x1xi32>
    %c0_i32 = arith.constant 0 : i32
    %3 = vector.broadcast %c0_i32 : i32 to vector<16x1xi32>
    %4 = arith.cmpi ne, %2, %3 : vector<16x1xi32>
    %5 = vector.broadcast %0 : i32 to vector<16x1xi32>
    %6 = arith.cmpi ne, %2, %5 : vector<16x1xi32>
    %7 = arith.andi %4, %6 : vector<16x1xi1>
    %8 = vector.broadcast %1 : i32 to vector<16x1xi32>
    %9 = arith.cmpi ne, %2, %8 : vector<16x1xi32>
    %10 = arith.andi %7, %9 : vector<16x1xi1>
    %11 = arith.extui %10 : vector<16x1xi1> to vector<16x1xi32>
    %12 = arith.sitofp %11 : vector<16x1xi32> to vector<16x1xf32>
    %c15_i32 = arith.constant 15 : i32
    %13 = vector.broadcast %c15_i32 : i32 to vector<16x1xi32>
    %14 = arith.cmpi ne, %2, %13 : vector<16x1xi32>
    %c1_i32 = arith.constant 1 : i32
    %15 = arith.subi %0, %c1_i32 : i32
    %16 = vector.broadcast %15 : i32 to vector<16x1xi32>
    %17 = arith.cmpi ne, %2, %16 : vector<16x1xi32>
    %18 = arith.andi %14, %17 : vector<16x1xi1>
    %c1_i32_0 = arith.constant 1 : i32
    %19 = arith.subi %1, %c1_i32_0 : i32
    %20 = vector.broadcast %19 : i32 to vector<16x1xi32>
    %21 = arith.cmpi ne, %2, %20 : vector<16x1xi32>
    %22 = arith.andi %18, %21 : vector<16x1xi1>
    %23 = arith.extui %22 : vector<16x1xi1> to vector<16x1xi32>
    %24 = arith.sitofp %23 : vector<16x1xi32> to vector<16x1xf32>
    %c0_1 = arith.constant 0 : index
    %c0_2 = arith.constant 0 : index
    %25 = vector.load %arg4[%c0_1, %c0_2] : memref<3x128xf32, #tpu.memory_space<vmem>>, vector<1x128xf32>
    %c1_3 = arith.constant 1 : index
    %c0_4 = arith.constant 0 : index
    %26 = vector.load %arg4[%c1_3, %c0_4] : memref<3x128xf32, #tpu.memory_space<vmem>>, vector<1x128xf32>
    %c2 = arith.constant 2 : index
    %c0_5 = arith.constant 0 : index
    %27 = vector.load %arg4[%c2, %c0_5] : memref<3x128xf32, #tpu.memory_space<vmem>>, vector<1x128xf32>
    %c0_6 = arith.constant 0 : index
    %c0_7 = arith.constant 0 : index
    %28 = vector.load %arg5[%c0_6, %c0_7] : memref<1x128xf32, #tpu.memory_space<vmem>>, vector<1x128xf32>
    %c0_8 = arith.constant 0 : index
    %c0_9 = arith.constant 0 : index
    %c0_10 = arith.constant 0 : index
    %29 = vector.load %arg3[%c0_8, %c0_9, %c0_10] : memref<1x16x128xf32, #tpu.memory_space<vmem>>, vector<1x16x128xf32>
    %30 = vector.shape_cast %29 : vector<1x16x128xf32> to vector<16x128xf32>
    %c1_i32_11 = arith.constant 1 : i32
    %31 = tpu.dynamic_rotate %30 by %c1_i32_11 dim 0 : vector<16x128xf32>, i32 -> vector<16x128xf32>
    %32 = vector.broadcast %12 : vector<16x1xf32> to vector<16x128xf32>
    %33 = arith.mulf %31, %32 : vector<16x128xf32>
    %c15_i32_12 = arith.constant 15 : i32
    %34 = tpu.dynamic_rotate %30 by %c15_i32_12 dim 0 : vector<16x128xf32>, i32 -> vector<16x128xf32>
    %35 = vector.broadcast %24 : vector<16x1xf32> to vector<16x128xf32>
    %36 = arith.mulf %34, %35 : vector<16x128xf32>
    %37 = vector.broadcast %25 : vector<1x128xf32> to vector<16x128xf32>
    %38 = arith.mulf %33, %37 : vector<16x128xf32>
    %39 = vector.broadcast %26 : vector<1x128xf32> to vector<16x128xf32>
    %40 = arith.mulf %30, %39 : vector<16x128xf32>
    %41 = arith.addf %38, %40 : vector<16x128xf32>
    %42 = vector.broadcast %27 : vector<1x128xf32> to vector<16x128xf32>
    %43 = arith.mulf %36, %42 : vector<16x128xf32>
    %44 = arith.addf %41, %43 : vector<16x128xf32>
    %45 = vector.broadcast %28 : vector<1x128xf32> to vector<16x128xf32>
    %46 = arith.addf %44, %45 : vector<16x128xf32>
    %c0_13 = arith.constant 0 : index
    %c0_14 = arith.constant 0 : index
    %c0_15 = arith.constant 0 : index
    %47 = vector.load %arg6[%c0_13, %c0_14, %c0_15] : memref<1x16x128xf32, #tpu.memory_space<vmem>>, vector<1x16x128xf32>
    %48 = vector.shape_cast %47 : vector<1x16x128xf32> to vector<16x128xf32>
    %49 = vector.shape_cast %46 : vector<16x128xf32> to vector<1x16x128xf32>
    tpu.vector_store %arg6[%c0_13, %c0_14, %c0_15], %49 {strides = array<i32>} : memref<1x16x128xf32, #tpu.memory_space<vmem>>, vector<1x16x128xf32>,
    return
  }
  func.func @transform_0(%arg0: i32, %arg1: i32, %arg2: memref<2xi32, #tpu.memory_space<smem>>) -> (i32, i32, i32) {
    %c0_i32 = arith.constant 0 : i32
    %c0_i32_0 = arith.constant 0 : i32
    return %arg0, %c0_i32, %arg1 : i32, i32, i32
  }
  func.func @transform_1(%arg0: i32, %arg1: i32, %arg2: memref<2xi32, #tpu.memory_space<smem>>) -> (i32, i32) {
    %c0_i32 = arith.constant 0 : i32
    %c0_i32_0 = arith.constant 0 : i32
    return %c0_i32, %arg1 : i32, i32
  }
  func.func @transform_2(%arg0: i32, %arg1: i32, %arg2: memref<2xi32, #tpu.memory_space<smem>>) -> (i32, i32) {
    %c0_i32 = arith.constant 0 : i32
    %c0_i32_0 = arith.constant 0 : i32
    return %c0_i32, %arg1 : i32, i32
  }
  func.func @transform_3(%arg0: i32, %arg1: i32, %arg2: memref<2xi32, #tpu.memory_space<smem>>) -> (i32, i32, i32) {
    %c0_i32 = arith.constant 0 : i32
    %c0_i32_0 = arith.constant 0 : i32
    return %arg0, %c0_i32, %arg1 : i32, i32, i32
  }
}

</mosaic_0001>

<bundles_post_ra>
// kernel: tpu_custom_call.1
= control target key start
LH: loop header
LB: loop body
LE: loop exit
PB: predicated region body
PF: predicated region fallthrough
CT: control target
= control target key end

     0   :  { %s720_s15 = smov [#allocation3]   ;;  %s954_s0 = inlined_call_operand.hbm [shape: s32[2], index: 0, kind: input, shape index: {}]   ;;  %s955_s1 = inlined_call_operand.hbm [shape: f32[2,16,128], index: 1, kind: input, shape index: {}]   ;;  %s956_s2 = inlined_call_operand.hbm [shape: f32[3,128], index: 2, kind: input, shape index: {}]   ;;  %s957_s3 = inlined_call_operand.vmem [shape: f32[1,128], index: 3, kind: input, shape index: {}]   ;;  %s958_s4 = inlined_call_operand.hbm [shape: f32[2,16,128], index: 4, kind: output, shape index: {}]  }
   0x1   :  { %961 = sst [smem:[#allocation14_spill]] %s956_s2 }
   0x2   :  { %10 = dma.hbm_to_smem %s954_s0, 16, %s720_s15, [#allocation2] }
   0x3   :  { %682 = dma.done.wait [#allocation2], 16 }
   0x4   :  { %683 = vsyncadd [#allocation2], 4294967280 }
   0x5   :  { %12 = sfence }
   0x6   :  { %13 = vsyncpa [#allocation5], 0 }
   0x7   :  { %15 = vsyncpa [#allocation5 + $0x1], 0 }
   0x8   :  { %16 = vsyncpa [#allocation8], 0 }
   0x9   :  { %17 = vsyncpa [#allocation6], 0 }
   0xa   :  { %19 = vsyncpa [#allocation6 + $0x1], 0  ;;  %s757_s18 = smov 0   ;;  %s759_s19 = smov 0  }
   0xb   :  { %s761_s20 = smov 0   ;;  %s763_s21 = smov 0  }
   0xc   :  { %s765_s22 = smov 0   ;;  %s767_s23 = smov 0  }
   0xd LB: > { %s460_s0 = sadd.s32 4294967295, %s718_s23   ;;  %s461_s24 = sadd.s32 4294967294, %s718_s23   ;;  %s718_s23 = sphi %s767_s23, %s25_s23   ;;  %s714_s22 = sphi %s765_s22, %s979_s22   ;;  %s710_s21 = sphi %s763_s21, %s978_s21   ;;  %s706_s20 = sphi %s761_s20, %s977_s20   ;;  %s702_s19 = sphi %s759_s19, %s976_s19   ;;  %s698_s18 = sphi %s757_s18, %s975_s18  }
   0xe   : > { %s46_s25 = sadd.s32 1, %s706_s20  ;;  %p53_p0 = scmp.ne.s32.totalorder %s706_s20, %s702_s19 }
   0xf   : > { %p54_p1 = scmp.eq.s32.totalorder %s718_s23, 0  ;;  %p59_p2 = scmp.ne.s32.totalorder %s702_s19, %s698_s18 }
  0x10   : > { %p795_p3 = scmp.eq.s32.totalorder %s460_s0, 0  ;;  %p137_p4 = scmp.eq.s32.totalorder %s460_s0, 1 }
  0x11   : > { %p799_p5 = por %p54_p1, %p53_p0  ;;  %p143_p6 = scmp.eq.s32.totalorder %s461_s24, 1 }
  0x12   : > { %p805_p7 = por %p795_p3, %p59_p2  ;;  %p809_p8 = por %p137_p4, %p53_p0 }
  0x13   : > { %p813_p9 = por %p143_p6, %p59_p2  ;;  %p462_p10 = scmp.ge.s32.totalorder %s718_s23, 1 }
  0x14   : > { %s964_s28 = scalar_select %p805_p7, 1, 0 }
  0x15   : > { %s965_s29 = scalar_select %p809_p8, 1, 0 }
  0x16   : > { %s966_s30 = scalar_select %p813_p9, 1, 0 }
  0x17   : > { %p150_p11 = scmp.lt.s32.totalorder %s718_s23, 3  ;;  %s721_s6 = smov [#allocation7]  }
  0x18   : > { %s165_s7 = sshll.u32 %s721_s6, 4  ;;  %p512_p1 = scmp.lt.s32.totalorder %s718_s23, 2  ;;  %s166_s7 = int_to_ptr.vmem [resolvable:$true] %s165_s7 }
  0x19   : > { %p820_p13 = pnand %p462_p10, %p150_p11  ;;  %s37_s10 = sadd.s32 1, %s714_s22 }
  0x1a   : > { %p829_p4 = pnand %p512_p1, %p799_p5  ;;  %p39_p6 = scmp.ge.s32.totalorder %s37_s10, 2 }
  0x1b   : > { %p499_p0 = pneg %p820_p13  ;;  %s182_s11 = sand.u32 1, %s706_s20  }
  0x1c   : > { %s589_s12 = scalar_lea.vmem %s166_s7, 64  ;;  %p597_p8 = scmp.lt.s32.totalorder %s166_s7, %s166_s7 }
  0x1d   : > { %p835_p2 = pnand %p499_p0, %p795_p3  ;;  %p590_p11 = scmp.ne.s32.totalorder %s166_s7, %s589_s12 }
  0x1e   : > { %p598_p5 = scmp.lt.s32.totalorder %s589_s12, %s589_s12 }
  0x1f   : > { %p580_p10 = pneg %p835_p2 }
  0x20   : > { %p599_p1 = por %p598_p5, %p597_p8 }
  0x21   : > { %p592_p12 = pnand %p590_p11, %p580_p10 }
  0x23   : > { %p593_p9 = pneg %p592_p12 }
  0x25   : > { %p600_p7 = pnand %p599_p1, %p593_p9 }
  0x27   : > { %603 = shalt.err (!%p600_p7)
}
  0x28   : > { %s970_s2 = sld [smem:[#allocation14_spill]]  ;;  %s981_s10 = smov (%p39_p6, %s37_s10), 0 }
  0x29   : > { %s466_s15 = sshll.u32 %s182_s11, 4  ;;  %s41_s16 = ssub.s32 %s714_s22, %s981_s10 }
  0x2a   : > { %p44_p12 = scmp.eq.s32.totalorder %s41_s16, 0  ;;  %s489_s17 = sshll.u32 %s714_s22, 8 }
  0x2b   : > { %s193_s27 = scalar_lea.hbm %s955_s1, %s489_s17  ;;  %s186_s6 = scalar_lea.vmem [#allocation4], %s466_s15 }
  0x2c   : > { %s194_s9 = sshll.u32 %s186_s6, 4  ;;  %s183_s13 = scalar_lea.sflag [#allocation5], %s182_s11  ;;  %s195_s9 = int_to_ptr.vmem [resolvable:$true] %s194_s9 }
  0x2d   : > { %s859_s12 = scalar_select %p44_p12, %s706_s20, %s46_s25  }
  0x2e   : > { %502 = dma.hbm_to_vmem [thread:$0]  (!%p835_p2), %s970_s2, 64, %s166_s7, [#allocation8]  }
  0x2f   : > { %p606_p7 = pneg %p829_p4  ;;  %s617_s7 = scalar_lea.vmem %s195_s9, 256 }
  0x30   : > { %p618_p8 = scmp.ne.s32.totalorder %s195_s9, %s617_s7  ;;  %s722_s14 = smov [#allocation4]  }
  0x31   : > { %s622_s16 = sshll.u32 %s722_s14, 4  ;;  %s623_s16 = int_to_ptr.vmem [resolvable:$false] %s622_s16 }
  0x32   : > { %p620_p9 = pnand %p618_p8, %p606_p7  ;;  %s624_s2 = scalar_lea.vmem %s623_s16, 512 }
  0x33   : > { %p625_p2 = scmp.lt.s32.totalorder %s195_s9, %s623_s16  ;;  %p626_p6 = scmp.lt.s32.totalorder %s624_s2, %s617_s7 }
  0x34   : > { %p621_p0 = pneg %p620_p9 }
  0x35   : > { %p627_p10 = por %p626_p6, %p625_p2 }
  0x37   : > { %p628_p11 = pnand %p627_p10, %p621_p0 }
  0x39   : > { %631 = shalt.err (!%p628_p11)
}
  0x3a   : > { %s723_s15 = smov 128   ;;  %s724_s25 = smov 8  }
  0x3b   : > { %506 = dma.hbm_to_vmem [thread:$0]  (!%p829_p4), %s193_s27, 256, %s195_s9, %s183_s13, %s723_s15, %s723_s15, %s724_s25  }
  0x3c   : > { %206 = sbr.rel (%p820_p13) target bundleno = 105 (0x69), region = 32  ;;  %s868_s11 = sand.u32 (!%p820_p13), 1, %s702_s19  }
  0x3d   : > { %s470_s17 = sshll.u32 (!%p820_p13), %s868_s11, 4  ;;  %s209_s2 = scalar_lea.sflag (!%p820_p13), [#allocation5], %s868_s11 }
  0x3e   : > { %s212_s0 = scalar_lea.vmem (!%p820_p13), [#allocation4], %s470_s17  ;;  %p971_p5 = scmp.ne.s32.totalorder (!%p820_p13), %s964_s28, 0 }
  0x41   : > { %685 = dma.done.wait (%p971_p5), %s209_s2, 256  }
  0x42   : > { %687 = vsyncadd (%p971_p5), %s209_s2, 4294967040 }
  0x43   : > { %689 = dma.done.wait (%p795_p3), [#allocation8], 64  }
  0x44   : > { %691 = vsyncadd (%p795_p3), [#allocation8], 4294967232  ;;  %v247_v0 = vlaneseq  ;;  %s882_s5 = sld [smem:[#allocation3]]  ;;  %v481_v4 = vld [vmem:[#allocation7 + $0x1] ss:$0 sm:$0xff]  ;;  %v289_v8 = vld [vmem:[%s212_s0 + $0x8] sm:$0xff] }
  0x45   : > { %s884_s8 = sld [smem:[#allocation3 + $0x1]]  ;;  %v288_v5 = vld [vmem:[%s212_s0] sm:$0xff]  ;;  %v291_v12 = vrot.slane %v289_v8, 7  ;;  %v298_v14 = vrot.slane %v289_v8, 1  ;;  %v725_v15 = vmov 0.0   ;;  %v315_v28 = vmul.f32 %v481_v4, %v289_v8  ;;  %s241_s6 = scalar_lea.vmem [#allocation9], %s470_s17 }
  0x46   : > { %v248_v1 = vshrl.u32 %v247_v0, 7  ;;  %v314_v9 = vmul.f32 %v481_v4, %v288_v5  ;;  %v290_v11 = vrot.slane %v288_v5, 7  ;;  %v297_v13 = vrot.slane %v288_v5, 1  ;;  %v480_v18 = vld [vmem:[#allocation7] ss:$0 sm:$0xff]  ;;  %s351_s9 = sshll.u32 %s241_s6, 4  ;;  %s901_s9 = int_to_ptr.vmem [resolvable:$true] %s351_s9 }
  0x47   : > { %v482_v19 = vld [vmem:[#allocation7 + $0x2] ss:$0 sm:$0xff]  ;;  %v483_v35 = vld [vmem:[%s957_s3] ss:$0 sm:$0xff]  ;;  %s490_s13 = sshll.u32 %s710_s21, 8  ;;  %s337_s15 = scalar_lea.sflag [#allocation6], %s868_s11 }
  0x48   : > { %v249_v2 = vadd.s32 8, %v248_v1  ;;  %vm250_vm0 = vcmp.ne.s32.totalorder %v248_v1, 0  ;;  %vm292_vm1 = vcmp.lt.s32.totalorder %v248_v1, 1  ;;  %vm299_vm2 = vcmp.lt.s32.totalorder %v248_v1, 7  ;;  %s906_s16 = scalar_lea.hbm %s958_s4, %s490_s13  ;;  %s632_s25 = scalar_lea.vmem %s901_s9, 256 }
  0x49   : > { %v294_v20 = vsel %vm292_vm1, %v291_v12, %v290_v11  ;;  %v300_v21 = vsel %vm299_vm2, %v297_v13, %v298_v14  ;;  %v293_v25 = vsel %vm292_vm1, %v290_v11, %v291_v12  ;;  %v301_v27 = vsel %vm299_vm2, %v298_v14, %v297_v13  ;;  %p633_p3 = scmp.ne.s32.totalorder %s901_s9, %s632_s25  ;;  %p972_p13 = scmp.ne.s32.totalorder %s965_s29, 0 }
  0x4a   : > { %v252_v3 = vstv %s882_s5  ;;  %s476_s28 = sadd.s32 4294967295, %s882_s5  ;;  %vm267_vm3 = vcmp.ne.s32.totalorder %v249_v2, 15  ;;  %s726_s21 = smov [#allocation9]  }
  0x4b   : > { %vm253_vm4 = vcmp.ne.s32.totalorder %v248_v1, %v252_v3  ;;  %v257_v6 = vstv %s884_s8  ;;  %v269_v7 = vstv %s476_s28  ;;  %s477_s26 = sadd.s32 4294967295, %s884_s8  ;;  %vm254_vm11 = vcmp.ne.s32.totalorder %v249_v2, %v252_v3  ;;  %p634_p4 = pnand %p633_p3, %p972_p13 }
  0x4c   : > { %vm255_vm5 = vmand %vm250_vm0, %vm253_vm4  ;;  %vm258_vm6 = vcmp.ne.s32.totalorder %v248_v1, %v257_v6  ;;  %vm270_vm7 = vcmp.ne.s32.totalorder %v248_v1, %v269_v7  ;;  %v275_v10 = vstv %s477_s26  ;;  %vm259_vm12 = vcmp.ne.s32.totalorder %v249_v2, %v257_v6  ;;  %s636_s17 = sshll.u32 %s726_s21, 4  ;;  %s637_s17 = int_to_ptr.vmem [resolvable:$false] %s636_s17 }
  0x4d   : > { %vm260_vm8 = vmand %vm255_vm5, %vm258_vm6  ;;  %vm276_vm9 = vcmp.ne.s32.totalorder %v248_v1, %v275_v10  ;;  %vm271_vm13 = vcmp.ne.s32.totalorder %v249_v2, %v269_v7  ;;  %vm277_vm15 = vcmp.ne.s32.totalorder %v249_v2, %v275_v10  ;;  %p635_p1 = pneg %p634_p4  ;;  %s638_s2 = scalar_lea.vmem %s637_s17, 512 }
  0x4e   : > { %v474_v16 = vsel %vm260_vm8, 1.0, %v725_v15  ;;  %vm278_vm10 = vmand %vm270_vm7, %vm276_vm9  ;;  %p639_p12 = scmp.lt.s32.totalorder %s901_s9, %s637_s17  ;;  %p640_p7 = scmp.lt.s32.totalorder %s638_s2, %s632_s25 }
  0x4f   : > { %v478_v17 = vsel %vm278_vm10, 1.0, %v725_v15  ;;  %vm261_vm14 = vmand %vm254_vm11, %vm259_vm12  ;;  %v295_v22 = vmul.f32 %v474_v16, %v294_v20 }
  0x50   : > { %v302_v23 = vmul.f32 %v478_v17, %v300_v21  ;;  %v475_v24 = vsel %vm261_vm14, 1.0, %v725_v15  ;;  %vm273_vm0 = vmand %vm267_vm3, %vm271_vm13  ;;  %p641_p8 = por %p640_p7, %p639_p12 }
  0x51   : > { %vm279_vm4 = vmand %vm273_vm0, %vm277_vm15  ;;  %v296_v26 = vmul.f32 %v475_v24, %v293_v25  ;;  %v308_v29 = vmul.f32 %v480_v18, %v295_v22 }
  0x52   : > { %v322_v30 = vmul.f32 %v482_v19, %v302_v23  ;;  %v479_v31 = vsel %vm279_vm4, 1.0, %v725_v15  ;;  %p642_p9 = pnand %p641_p8, %p635_p1 }
  0x53   : > { %v303_v32 = vmul.f32 %v479_v31, %v301_v27  ;;  %v309_v33 = vmul.f32 %v480_v18, %v296_v26  ;;  %v316_v34 = vadd.f32 %v314_v9, %v308_v29 }
  0x55   : > { %v317_v36 = vadd.f32 %v315_v28, %v309_v33  ;;  %v323_v37 = vmul.f32 %v482_v19, %v303_v32  ;;  %v324_v38 = vadd.f32 %v322_v30, %v316_v34 }
  0x57   : > { %v325_v39 = vadd.f32 %v323_v37, %v317_v36  ;;  %v332_v40 = vadd.f32 %v483_v35, %v324_v38 }
  0x59   : > { %v333_v41 = vadd.f32 %v483_v35, %v325_v39  ;;  %334 = vst [vmem:[%s241_s6] sm:$0xff] %v332_v40 }
  0x5b   : > { %335 = vst [vmem:[%s241_s6 + $0x8] sm:$0xff] %v333_v41 }
  0x5c   : > { %645 = shalt.err (!%p642_p9)
}
  0x5d   : > { %s646_s0 = scalar_lea.hbm %s906_s16, 256  ;;  %s650_s28 = scalar_lea.hbm %s958_s4, 512 }
  0x5e   : > { %p647_p0 = scmp.ne.s32.totalorder %s906_s16, %s646_s0  ;;  %p651_p10 = scmp.lt.s32.totalorder %s906_s16, %s958_s4 }
  0x5f   : > { %p652_p11 = scmp.lt.s32.totalorder %s650_s28, %s646_s0 }
  0x60   : > { %p648_p2 = pnand %p647_p0, %p972_p13 }
  0x61   : > { %p653_p5 = por %p652_p11, %p651_p10 }
  0x62   : > { %p649_p6 = pneg %p648_p2 }
  0x64   : > { %p654_p3 = pnand %p653_p5, %p649_p6 }
  0x66   : > { %657 = shalt.err (!%p654_p3)
}
  0x67   : > { %s727_s27 = smov 128   ;;  %s728_s6 = smov 8  }
  0x68   : > { %497 = dma.vmem_to_hbm [thread:$0]  (%p972_p13), %s901_s9, 256, %s906_s16, %s337_s15, %s727_s27, %s727_s27, %s728_s6  }
  0x69 PF: > { %s366_s13 = sand.u32 1, %s698_s18   ;;  %p973_p4 = scmp.ne.s32.totalorder %s966_s30, 0 }
  0x6a   : > { %p974_p1 = scmp.ge.s32.totalorder %s718_s23, 2  ;;  %s367_s7 = scalar_lea.sflag [#allocation6], %s366_s13 }
  0x6c   : > { %p508_p12 = pnand %p974_p1, %p973_p4 }
  0x6e   : > { %p509_p7 = pneg %p508_p12 }
  0x70   : > { %693 = dma.done.wait (%p509_p7), %s367_s7, 256  }
  0x71   : > { %695 = vsyncadd (%p509_p7), %s367_s7, 4294967040  ;;  %s25_s23 = sadd.s32 1, %s718_s23   ;;  %s975_s18 = smov %s702_s19 }
  0x72   : > { %p22_p8 = scmp.ge.s32.totalorder %s25_s23, 4   ;;  %s976_s19 = smov %s706_s20 }
  0x73   : > { %s977_s20 = smov %s859_s12  ;;  %s978_s21 = smov %s714_s22 }
  0x74   : > { %s979_s22 = smov %s981_s10  ;;  %24 = sbr.rel (!%p22_p8) target bundleno = 13 (0xd), region = 85 }
  0x79   :  { %372 = vsyncpa [#allocation5], 1 }
  0x7a   :  { %374 = vsyncpa [#allocation5 + $0x1], 1 }
  0x7b   :  { %375 = vsyncpa [#allocation8], 1 }
  0x7c   :  { %376 = vsyncpa [#allocation6], 1 }
  0x7d   :  { %378 = vsyncpa [#allocation6 + $0x1], 1 }

</bundles_post_ra>
